<compile_context>
chip_gen: v7x
topology: tpu7x:2x2x1
jax: 0.10.0
libtpu: 0.0.40
codegen_flags: <defaults>
</compile_context>

<pallas_src>
import functools
import math

import jax
import jax.numpy as jnp
import numpy as np
from jax.experimental import pallas as pl
from jax.experimental.pallas import tpu as pltpu

LANE = 128
SUBLANE = 8
OUT_W = 8  # compact output width: q1 in col 0, q2 in col 1, rest zero


def _round_up(x, m):
    return (x + m - 1) // m * m


# ----------------------------------------------------------------------------
# Parameter init (PyTorch nn.Linear-style), weights stored as (in, out).
# ----------------------------------------------------------------------------
def init_mlp_params(key, inputs_dim, outputs_dim, n_layer, n_unit):
    dims = [inputs_dim] + [n_unit] * (n_layer - 1) + [outputs_dim]
    params = []
    for li in range(n_layer):
        fan_in, fan_out = dims[li], dims[li + 1]
        bound = 1.0 / math.sqrt(fan_in)
        key, kw, kb = jax.random.split(key, 3)
        w = jax.random.uniform(kw, (fan_in, fan_out), jnp.float32, -bound, bound)
        b = jax.random.uniform(kb, (1, fan_out), jnp.float32, -bound, bound)
        params.extend([w, b])
    return params, key


# ----------------------------------------------------------------------------
# Pack both towers into one flat (P_ROWS, COLS) buffer.
#   layer 0     : W_fused = [W_q1 | W_q2]            (in_pad, 2H), zero-padded rows
#   hidden li   : W_fused = block_diag(W_q1, W_q2)   (COLS, COLS)
#                 (for n_unit >= 128 one would instead store two aligned (H, H)
#                  segments and do two matmuls to avoid structural-zero FLOPs)
#   final layer : q1 -> column 0, q2 -> column 1, all other columns zero; the
#                 kernel only reads lanes [0:OUT_W] of this segment.
# Each segment = (weight rows padded to a multiple of 8), then one bias row,
# padded to a multiple of 8 rows, so all in-kernel slices are sublane-aligned.
# ----------------------------------------------------------------------------
def pack_double_q_params(q1_params, q2_params, state_dim, action_dim, n_layer, n_unit):
    in_dim = state_dim + action_dim
    in_pad = _round_up(in_dim, SUBLANE)
    h2 = 2 * n_unit
    cols = max(_round_up(h2, LANE), LANE)
    assert OUT_W <= cols

    segs, layer_meta, row = [], [], 0
    for li in range(n_layer):
        w1 = np.asarray(q1_params[2 * li], np.float32)
        b1 = np.asarray(q1_params[2 * li + 1], np.float32)
        w2 = np.asarray(q2_params[2 * li], np.float32)
        b2 = np.asarray(q2_params[2 * li + 1], np.float32)

        if li == 0:
            w_rows = in_pad
            w = np.zeros((w_rows, cols), np.float32)
            b = np.zeros((1, cols), np.float32)
            w[:in_dim, :n_unit] = w1
            w[:in_dim, n_unit:h2] = w2
            b[0, :n_unit] = b1[0]
            b[0, n_unit:h2] = b2[0]
        elif li < n_layer - 1:
            w_rows = cols
            w = np.zeros((w_rows, cols), np.float32)
            b = np.zeros((1, cols), np.float32)
            w[:n_unit, :n_unit] = w1
            w[n_unit:h2, n_unit:h2] = w2
            b[0, :n_unit] = b1[0]
            b[0, n_unit:h2] = b2[0]
        else:  # final layer: outputs_dim == 1 per tower
            w_rows = cols
            w = np.zeros((w_rows, cols), np.float32)
            b = np.zeros((1, cols), np.float32)
            w[:n_unit, 0] = w1[:, 0]
            w[n_unit:h2, 1] = w2[:, 0]
            b[0, 0] = b1[0, 0]
            b[0, 1] = b2[0, 0]

        seg_rows = _round_up(w_rows + 1, SUBLANE)
        seg = np.zeros((seg_rows, cols), np.float32)
        seg[:w_rows] = w
        seg[w_rows] = b
        segs.append(seg)
        layer_meta.append((row, w_rows))
        row += seg_rows

    packed = jnp.asarray(np.concatenate(segs, axis=0))
    return packed, tuple(layer_meta), cols, in_pad


# ----------------------------------------------------------------------------
# Kernel: one batch tile, both fused towers, compact (tb, OUT_W) store.
# ----------------------------------------------------------------------------
def _double_q_kernel(n_layer, layer_meta, out_w, xa_ref, p_ref, out_ref):
    h = xa_ref[...]                                  # (tb, in_pad), zero-padded cols
    for li in range(n_layer):
        off, w_rows = layer_meta[li]
        if li < n_layer - 1:
            w = p_ref[off:off + w_rows, :]           # aligned (w_rows, cols) slice
            b = p_ref[off + w_rows:off + w_rows + 1, :]
            h = jnp.maximum(
                jnp.dot(h, w, preferred_element_type=jnp.float32) + b, 0.0)
        else:
            # Narrow final layer: only the first out_w lanes of the packed
            # segment are used, so the MXU emits the compact (tb, out_w) result
            # directly (q1 in col 0, q2 in col 1, rest exact zeros).
            w = p_ref[off:off + w_rows, 0:out_w]
            b = p_ref[off + w_rows:off + w_rows + 1, 0:out_w]
            h = jnp.dot(h, w, preferred_element_type=jnp.float32) + b
    out_ref[...] = h


# ----------------------------------------------------------------------------
# Wrapper
# ----------------------------------------------------------------------------
def double_q_forward(x, a, packed_params, *, layer_meta, n_layer, cols, in_pad,
                     tile_b=1024):
    assert x.shape[0] == a.shape[0]
    assert x.ndim == 2 and a.ndim == 2
    batch = x.shape[0]
    in_dim = x.shape[1] + a.shape[1]
    p_rows = packed_params.shape[0]

    # Single merged (and zero-padded to in_pad columns) input: one DMA stream,
    # one aligned K=in_pad layer-0 matmul.  The XLA-side concat of an 8-wide
    # f32 array is essentially free.
    parts = [x, a]
    if in_pad > in_dim:
        parts.append(jnp.zeros((batch, in_pad - in_dim), x.dtype))
    xa = jnp.concatenate(parts, axis=1)

    # Batch tile: big for pipelining (per-step overhead ~0.35us), but capped so
    # the grid has >= 2 "parallel" steps whenever possible, keeping v7x's
    # second TensorCore busy for mid-sized batches.
    tb = min(tile_b, _round_up(pl.cdiv(batch, 2), SUBLANE))
    if tb >= batch:
        tb = batch  # single full-extent block (always a legal block shape)
    grid = (pl.cdiv(batch, tb),)

    kernel = functools.partial(_double_q_kernel, n_layer, layer_meta, OUT_W)
    out = pl.pallas_call(
        kernel,
        out_shape=jax.ShapeDtypeStruct((batch, OUT_W), jnp.float32),
        grid_spec=pltpu.PrefetchScalarGridSpec(
            num_scalar_prefetch=0,
            grid=grid,
            in_specs=[
                # batch-tiled merged input
                pl.BlockSpec((tb, in_pad), lambda i: (i, 0)),
                # packed weights: constant block index -> resident in VMEM,
                # DMA'd once (block-revisit optimization), ~144 KiB.
                pl.BlockSpec((p_rows, cols), lambda i: (0, 0)),
            ],
            # compact output slab (last dim == full array dim -> legal block)
            out_specs=pl.BlockSpec((tb, OUT_W), lambda i: (i, 0)),
        ),
        compiler_params=pltpu.CompilerParams(
            dimension_semantics=("parallel",),
            # Per-step VMEM (< ~2 MiB at tb<=2048 incl. double buffers) is far
            # below even v5e's 16 MiB default scoped limit; no override needed.
        ),
    )(xa, packed_params)

    return out[:, 0:1], out[:, 1:2]


# ----------------------------------------------------------------------------
# Pure-JAX reference (unfused, matches the PyTorch module semantics).
# ----------------------------------------------------------------------------
def reference_forward(x, a, q1_params, q2_params, n_layer):
    xa = jnp.concatenate([x, a], axis=1)

    def mlp(params, h):
        for li in range(n_layer):
            w, b = params[2 * li], params[2 * li + 1]
            h = h @ w + b
            if li != n_layer - 1:
                h = jnp.maximum(h, 0.0)
        return h

    return mlp(q1_params, xa), mlp(q2_params, xa)


if __name__ == "__main__":
    state_dim = 6
    action_dim = 2
    n_layer = 3
    n_unit = 32
    inputs_dim = state_dim + action_dim

    key = jax.random.PRNGKey(0)
    q1_params, key = init_mlp_params(key, inputs_dim, 1, n_layer, n_unit)
    q2_params, key = init_mlp_params(key, inputs_dim, 1, n_layer, n_unit)

    packed, layer_meta, cols, in_pad = pack_double_q_params(
        q1_params, q2_params, state_dim, action_dim, n_layer, n_unit)

    # TODO(synk): use_batchrenorm=True path (BatchRenormalization) not implemented;
    # the default DoubleQNet forward does not use it.
    fwd = jax.jit(functools.partial(
        double_q_forward, layer_meta=layer_meta, n_layer=n_layer,
        cols=cols, in_pad=in_pad))

    # batch=8  : single-step grid (full-extent block)
    # batch=40 : multi-step grid with a partial last block (exercises pipelining)
    for batch in (8, 40):
        key, kx, ka = jax.random.split(key, 3)
        x = jax.random.normal(kx, (batch, state_dim), jnp.float32)
        a = jax.random.normal(ka, (batch, action_dim), jnp.float32)

        q1, q2 = fwd(x, a, packed)
        jax.block_until_ready((q1, q2))

        q1_ref, q2_ref = reference_forward(x, a, q1_params, q2_params, n_layer)
        assert q1.shape == (batch, 1) and q2.shape == (batch, 1)
        assert jnp.allclose(q1, q1_ref, atol=1e-5, rtol=1e-5)
        assert jnp.allclose(q2, q2_ref, atol=1e-5, rtol=1e-5)

    print("KERNEL_OK")
</pallas_src>

<mosaic_0001>
module attributes {stable_mosaic.version = 11 : i64} {
  func.func @_double_q_kernel(%arg0: i32, %arg1: memref<8x8xf32, #tpu.memory_space<vmem>>, %arg2: memref<288x128xf32, #tpu.memory_space<vmem>>, %arg3: memref<8x8xf32, #tpu.memory_space<vmem>>) attributes {dimension_semantics = [#tpu.dimension_semantics<parallel>], iteration_bounds = array<i64: 1>, scalar_prefetch = 0 : i64, scratch_operands = 0 : i64, tpu.core_type = #tpu.core_type<tc>, window_params = [{transform_indices = @transform_0, window_bounds = array<i64: 8, 8>}, {pipeline_mode = #tpu.pipeline_mode<synchronous>, transform_indices = @transform_1, window_bounds = array<i64: 288, 128>}, {transform_indices = @transform_2, window_bounds = array<i64: 8, 8>}]} {
    %c0 = arith.constant 0 : index
    %c0_0 = arith.constant 0 : index
    %0 = vector.load %arg1[%c0, %c0_0] : memref<8x8xf32, #tpu.memory_space<vmem>>, vector<8x8xf32>
    %c0_1 = arith.constant 0 : index
    %c0_2 = arith.constant 0 : index
    %1 = vector.load %arg2[%c0_1, %c0_2] : memref<288x128xf32, #tpu.memory_space<vmem>>, vector<8x128xf32>
    %c8 = arith.constant 8 : index
    %c0_3 = arith.constant 0 : index
    %2 = vector.load %arg2[%c8, %c0_3] : memref<288x128xf32, #tpu.memory_space<vmem>>, vector<1x128xf32>
    %cst = arith.constant dense<0.000000e+00> : vector<8x128xf32>
    %3 = tpu.matmul %0, %1, %cst {dimension_numbers = #tpu.dot_dimension_numbers<[1], [0], [0], [1], [0, 0, 1, 1], [], []>} : vector<8x8xf32>, vector<8x128xf32>, vector<8x128xf32> -> vector<8x128xf32>
    %4 = vector.broadcast %2 : vector<1x128xf32> to vector<8x128xf32>
    %5 = arith.addf %3, %4 : vector<8x128xf32>
    %cst_4 = arith.constant 0.000000e+00 : f32
    %6 = vector.broadcast %cst_4 : f32 to vector<8x128xf32>
    %7 = arith.maximumf %5, %6 : vector<8x128xf32>
    %c16 = arith.constant 16 : index
    %c0_5 = arith.constant 0 : index
    %8 = vector.load %arg2[%c16, %c0_5] : memref<288x128xf32, #tpu.memory_space<vmem>>, vector<128x128xf32>
    %c144 = arith.constant 144 : index
    %c0_6 = arith.constant 0 : index
    %9 = vector.load %arg2[%c144, %c0_6] : memref<288x128xf32, #tpu.memory_space<vmem>>, vector<1x128xf32>
    %cst_7 = arith.constant dense<0.000000e+00> : vector<8x128xf32>
    %10 = tpu.matmul %7, %8, %cst_7 {dimension_numbers = #tpu.dot_dimension_numbers<[1], [0], [0], [1], [0, 0, 1, 1], [], []>} : vector<8x128xf32>, vector<128x128xf32>, vector<8x128xf32> -> vector<8x128xf32>
    %11 = vector.broadcast %9 : vector<1x128xf32> to vector<8x128xf32>
    %12 = arith.addf %10, %11 : vector<8x128xf32>
    %cst_8 = arith.constant 0.000000e+00 : f32
    %13 = vector.broadcast %cst_8 : f32 to vector<8x128xf32>
    %14 = arith.maximumf %12, %13 : vector<8x128xf32>
    %c152 = arith.constant 152 : index
    %c0_9 = arith.constant 0 : index
    %15 = vector.load %arg2[%c152, %c0_9] : memref<288x128xf32, #tpu.memory_space<vmem>>, vector<128x8xf32>
    %c280 = arith.constant 280 : index
    %c0_10 = arith.constant 0 : index
    %16 = vector.load %arg2[%c280, %c0_10] : memref<288x128xf32, #tpu.memory_space<vmem>>, vector<1x8xf32>
    %cst_11 = arith.constant dense<0.000000e+00> : vector<8x8xf32>
    %17 = tpu.matmul %14, %15, %cst_11 {dimension_numbers = #tpu.dot_dimension_numbers<[1], [0], [0], [1], [0, 0, 1, 1], [], []>} : vector<8x128xf32>, vector<128x8xf32>, vector<8x8xf32> -> vector<8x8xf32>
    %18 = vector.broadcast %16 : vector<1x8xf32> to vector<8x8xf32>
    %19 = arith.addf %17, %18 : vector<8x8xf32>
    %c0_12 = arith.constant 0 : index
    %c0_13 = arith.constant 0 : index
    %20 = vector.load %arg3[%c0_12, %c0_13] : memref<8x8xf32, #tpu.memory_space<vmem>>, vector<8x8xf32>
    tpu.vector_store %arg3[%c0_12, %c0_13], %19 {strides = array<i32>} : memref<8x8xf32, #tpu.memory_space<vmem>>, vector<8x8xf32>,
    return
  }
  func.func @transform_0(%arg0: i32) -> (i32, i32) {
    %c0_i32 = arith.constant 0 : i32
    %c0_i32_0 = arith.constant 0 : i32
    return %arg0, %c0_i32 : i32, i32
  }
  func.func @transform_1(%arg0: i32) -> (i32, i32) {
    %c0_i32 = arith.constant 0 : i32
    %c0_i32_0 = arith.constant 0 : i32
    %c0_i32_1 = arith.constant 0 : i32
    return %c0_i32, %c0_i32_0 : i32, i32
  }
  func.func @transform_2(%arg0: i32) -> (i32, i32) {
    %c0_i32 = arith.constant 0 : i32
    %c0_i32_0 = arith.constant 0 : i32
    return %arg0, %c0_i32 : i32, i32
  }
}

</mosaic_0001>

<bundles_post_ra>
// kernel: double_q_forward.1
= control target key start
LH: loop header
LB: loop body
LE: loop exit
PB: predicated region body
PF: predicated region fallthrough
CT: control target
= control target key end

     0   :  { %7 = vsyncpa [#allocation3], 0  ;;  %s489_s9 = smov [#allocation2]   ;;  %s549_s0 = inlined_call_operand.vmem [shape: f32[8,8], index: 0, kind: input, shape index: {}]   ;;  %s550_s1 = inlined_call_operand.hbm [shape: f32[288,128], index: 1, kind: input, shape index: {}]   ;;  %s551_s2 = inlined_call_operand.vmem [shape: f32[8,8], index: 2, kind: output, shape index: {}]  }
   0x1   :  { %s15_s10 = sshll.u32 %s489_s9, 4  ;;  %s465_s13 = scalar_lea.hbm %s550_s1, 4608  ;;  %s16_s10 = int_to_ptr.vmem [resolvable:$true] %s15_s10 }
   0x2   :  { %p466_p0 = scmp.ne.s32.totalorder %s550_s1, %s465_s13  ;;  %p469_p1 = scmp.lt.u32.totalorder %s465_s13, %s550_s1 }
   0x4   :  { %p471_p2 = pnand %p469_p1, %p466_p0 }
   0x6   :  { %474 = shalt.err (!%p471_p2)
}
   0x7   :  { %s475_s18 = scalar_lea.vmem %s16_s10, 4608  ;;  %p480_p4 = scmp.lt.s32.totalorder %s16_s10, %s16_s10 }
   0x8   :  { %p476_p3 = scmp.ne.s32.totalorder %s16_s10, %s475_s18  ;;  %p481_p5 = scmp.lt.s32.totalorder %s475_s18, %s475_s18 }
   0xa   :  { %p482_p6 = por %p481_p5, %p480_p4 }
   0xc   :  { %p483_p7 = pnand %p482_p6, %p476_p3 }
   0xe   :  { %486 = shalt.err (!%p483_p7)
}
   0xf   :  { %s490_s19 = smov 128   ;;  %s491_s20 = smov 8  }
  0x10   :  { %21 = dma.hbm_to_vmem [thread:$0]  %s550_s1, 4608, %s16_s10, [#allocation3], %s490_s19, %s490_s19, %s491_s20  }
  0x11   :  { %487 = dma.done.wait [#allocation3], 4608  }
  0x12   :  { %488 = vsyncadd [#allocation3], 4294962688  ;;  %v492_v0 = vmov 0.0   ;;  %vm493_vm0 = vmmov 0   ;;  %v494_v1 = vmov 0.0|0.0   ;;  %vm32_vm1 = vcmask 64512  }
  0x13   :  { %336 = vmatprep.subr.mxu0 %v492_v0  ;;  %338 = vmatprep.mubr.msk.f32.mxu0 %vm493_vm0, %v492_v0  ;;  %v26_v2 = vld [vmem:[#allocation2] sm:$0xff]  ;;  %v107_v4 = vld [vmem:[#allocation2 + $0x10] sm:$0xff]  ;;  %v108_v5 = vld [vmem:[#allocation2 + $0x18] sm:$0xff] }
  0x14   :  { %411 = vmatprep.subr.bf16.mxu1 %v494_v1  ;;  %373 = vmatprep.mubr.msk.f32.mxu1 %vm493_vm0, %v492_v0  ;;  %v25_v3 = vld [vmem:[%s549_s0] sm:$0xff]  ;;  %v110_v7 = vld [vmem:[#allocation2 + $0x28] sm:$0xff]  ;;  %v412_v8 = vpack.c.bf16 %v108_v5, %v107_v4  ;;  %v111_v10 = vld [vmem:[#allocation2 + $0x30] sm:$0xff] }
  0x15   :  { %337 = vmatpush3.msra.mxu0 %v26_v2  ;;  %v109_v6 = vld [vmem:[#allocation2 + $0x20] sm:$0xff]  ;;  %v112_v11 = vld [vmem:[#allocation2 + $0x38] sm:$0xff]  ;;  %v114_v14 = vld [vmem:[#allocation2 + $0x48] sm:$0xff] }
  0x16   :  { %339 = vmatmul.mubr.msk.f32.vlgmr.msra.gmra.mrb[0].mxu0 %vm32_vm1, %v25_v3  ;;  %435 = vmatprep.subr.bf16.mxu0 %v494_v1  ;;  %v415_v9 = vpack.c.bf16 %v110_v7, %v109_v6  ;;  %v418_v12 = vpack.c.bf16 %v112_v11, %v111_v10  ;;  %v113_v13 = vld [vmem:[#allocation2 + $0x40] sm:$0xff]  ;;  %v115_v16 = vld [vmem:[#allocation2 + $0x50] sm:$0xff]  ;;  %v116_v17 = vld [vmem:[#allocation2 + $0x58] sm:$0xff] }
  0x17   :  { %408 = vmatprep.mubr.msk.f32.mxu0 %vm493_vm0, %v492_v0  ;;  %413 = vmatpush3.bf16.msra.mxu1 %v412_v8  ;;  %v421_v15 = vpack.c.bf16 %v114_v14, %v113_v13  ;;  %v424_v18 = vpack.c.bf16 %v116_v17, %v115_v16  ;;  %v117_v19 = vld [vmem:[#allocation2 + $0x60] sm:$0xff]  ;;  %v118_v20 = vld [vmem:[#allocation2 + $0x68] sm:$0xff]  ;;  %v119_v22 = vld [vmem:[#allocation2 + $0x70] sm:$0xff] }
  0x18   :  { %414 = vmatprep.subr.bf16.mxu1 %v494_v1  ;;  %v427_v21 = vpack.c.bf16 %v118_v20, %v117_v19  ;;  %v120_v23 = vld [vmem:[#allocation2 + $0x78] sm:$0xff]  ;;  %v121_v25 = vld [vmem:[#allocation2 + $0x80] sm:$0xff]  ;;  %v122_v26 = vld [vmem:[#allocation2 + $0x88] sm:$0xff] }
  0x19   :  { %v430_v24 = vpack.c.bf16 %v120_v23, %v119_v22  ;;  %v433_v27 = vpack.c.bf16 %v122_v26, %v121_v25  ;;  %v199_v28 = vld [vmem:[#allocation2 + $0x98] sm:$0xff]  ;;  %v200_v29 = vld [vmem:[#allocation2 + $0xa0] sm:$0xff]  ;;  %v201_v30 = vld [vmem:[#allocation2 + $0xa8] sm:$0xff] }
  0x1a   :  { %v436_v31 = vpack.c.bf16 %v200_v29, %v199_v28  ;;  %v202_v32 = vld [vmem:[#allocation2 + $0xb0] sm:$0xff]  ;;  %v203_v34 = vld [vmem:[#allocation2 + $0xb8] sm:$0xff]  ;;  %v204_v35 = vld [vmem:[#allocation2 + $0xc0] sm:$0xff] }
  0x1b   :  { %416 = vmatpush3.bf16.msra.mxu1 %v415_v9  ;;  %v439_v33 = vpack.c.bf16 %v202_v32, %v201_v30  ;;  %v442_v36 = vpack.c.bf16 %v204_v35, %v203_v34  ;;  %v205_v37 = vld [vmem:[#allocation2 + $0xc8] sm:$0xff]  ;;  %v206_v38 = vld [vmem:[#allocation2 + $0xd0] sm:$0xff]  ;;  %v207_v40 = vld [vmem:[#allocation2 + $0xd8] sm:$0xff] }
  0x1c   :  { %417 = vmatprep.subr.bf16.mxu1 %v494_v1  ;;  %437 = vmatpush3.bf16.msra.mxu0 %v436_v31  ;;  %v445_v39 = vpack.c.bf16 %v206_v38, %v205_v37  ;;  %v208_v41 = vld [vmem:[#allocation2 + $0xe0] sm:$0xff]  ;;  %v209_v43 = vld [vmem:[#allocation2 + $0xe8] sm:$0xff]  ;;  %v210_v44 = vld [vmem:[#allocation2 + $0xf0] sm:$0xff] }
  0x1d   :  { %438 = vmatprep.subr.bf16.mxu0 %v494_v1  ;;  %v448_v42 = vpack.c.bf16 %v208_v41, %v207_v40  ;;  %v451_v45 = vpack.c.bf16 %v210_v44, %v209_v43  ;;  %v211_v46 = vld [vmem:[#allocation2 + $0xf8] sm:$0xff]  ;;  %v212_v47 = vld [vmem:[#allocation2 + $0x100] sm:$0xff]  ;;  %v296_v49 = vld [vmem:[#allocation2 + $0x8] ss:$0 sm:$0xff] }
  0x1e   :  { %v454_v48 = vpack.c.bf16 %v212_v47, %v211_v46  ;;  %v213_v54 = vld [vmem:[#allocation2 + $0x108] sm:$0xff]  ;;  %v214_v55 = vld [vmem:[#allocation2 + $0x110] sm:$0xff]  ;;  %v299_v62 = vld [vmem:[#allocation2 + $0x118] ss:$0 sm:$0xff] }
  0x1f   :  { %419 = vmatpush3.bf16.msra.mxu1 %v418_v12  ;;  %v457_v56 = vpack.c.bf16 %v214_v55, %v213_v54  ;;  %v298_v57 = vld [vmem:[#allocation2 + $0x90] ss:$0 sm:$0xff] }
  0x20   :  { %420 = vmatprep.subr.bf16.mxu1 %v494_v1  ;;  %440 = vmatpush3.bf16.msra.mxu0 %v439_v33 }
  0x21   :  { %441 = vmatprep.subr.bf16.mxu0 %v494_v1 }
  0x23   :  { %422 = vmatpush3.bf16.msra.mxu1 %v421_v15 }
  0x24   :  { %423 = vmatprep.subr.bf16.mxu1 %v494_v1  ;;  %443 = vmatpush3.bf16.msra.mxu0 %v442_v36 }
  0x25   :  { %444 = vmatprep.subr.bf16.mxu0 %v494_v1 }
  0x27   :  { %425 = vmatpush3.bf16.msra.mxu1 %v424_v18 }
  0x28   :  { %426 = vmatprep.subr.bf16.mxu1 %v494_v1  ;;  %446 = vmatpush3.bf16.msra.mxu0 %v445_v39 }
  0x29   :  { %447 = vmatprep.subr.bf16.mxu0 %v494_v1 }
  0x2b   :  { %428 = vmatpush3.bf16.msra.mxu1 %v427_v21 }
  0x2c   :  { %429 = vmatprep.subr.bf16.mxu1 %v494_v1  ;;  %449 = vmatpush3.bf16.msra.mxu0 %v448_v42 }
  0x2d   :  { %450 = vmatprep.subr.bf16.mxu0 %v494_v1 }
  0x2f   :  { %431 = vmatpush3.bf16.msra.mxu1 %v430_v24 }
  0x30   :  { %432 = vmatprep.subr.bf16.mxu1 %v494_v1  ;;  %452 = vmatpush3.bf16.msra.mxu0 %v451_v45 }
  0x31   :  { %453 = vmatprep.subr.bf16.mxu0 %v494_v1 }
  0x33   :  { %434 = vmatpush3.bf16.msra.mxu1 %v433_v27 }
  0x34   :  { %455 = vmatpush3.bf16.msra.mxu0 %v454_v48 }
  0x35   :  { %456 = vmatprep.subr.bf16.mxu0 %v494_v1 }
  0x38   :  { %458 = vmatpush3.bf16.msra.mxu0 %v457_v56 }
  0xe9   :  { %v102_v50 = vpop.f32.mrb[0].mxu0 }
  0xea   :  { %v103_v51 = vadd.f32 %v296_v49, %v102_v50  ;;  %v340_v52 = vpop.f32.mrb[1].mxu0 }
  0xec   :  { %v106_v53 = vmax.f32 %v103_v51, 0.0 }
  0xee   :  { %374 = vmatmul.mubr.f32.vlgmr.msra.gmra.mrb[0].mxu1 %v106_v53 }
 0x1c1   :  { %v194_v58 = vpop.f32.mrb[0].mxu1 }
 0x1c2   :  { %v195_v59 = vadd.f32 %v298_v57, %v194_v58  ;;  %v375_v60 = vpop.f32.mrb[1].mxu1 }
 0x1c4   :  { %v198_v61 = vmax.f32 %v195_v59, 0.0 }
 0x1c6   :  { %409 = vmatmul.mubr.f32.vlgmr.msra.gmra.mrb[2].mxu0 %v198_v61 }
 0x299   :  { %v286_v63 = vpop.f32.mrb[2].mxu0 }
 0x29a   :  { %v287_v0 = vadd.f32 %v299_v62, %v286_v63  ;;  %v410_v1 = vpop.f32.mrb[3].mxu0 }
 0x29c   :  { %290 = vst.msk [vmem:[%s551_s2] sm:$0xff] %vm32_vm1, %v287_v0 }
 0x29d   :  { %295 = vsyncpa [#allocation3], 1 }

</bundles_post_ra>
